<compile_context>
chip_gen: v7x
topology: tpu7x:2x2x1
jax: 0.10.0
libtpu: 0.0.40
codegen_flags: <defaults>
</compile_context>

<pallas_src>
import functools

import jax
import jax.numpy as jnp
from jax.experimental import pallas as pl
from jax.experimental.pallas import tpu as pltpu


def _fdw_kernel(x_ref, wv_ref, wh_ref, b_ref, o_ref, *, k, pad, H, W, C):
    """One batch element. x_ref: (1, H, W*C); weights already BN-folded."""
    WC = W * C
    x = x_ref[0]                                   # (H, W*C), native dtype

    # Center taps (offset 0) of both factorized convs share the unshifted
    # tile; bias (folded BN shifts of both convs) is added here once.
    w_center = (wv_ref[pad, :] + wh_ref[pad, :]).reshape(1, WC)
    acc = x.astype(jnp.float32) * w_center + b_ref[0, :].reshape(1, WC)

    # k is small and static -> unrolled tap loop.  Shifted taps are built as
    # in-VMEM zero-filled shifts (no HBM padding pass):
    #   vertical  tap d: rows shift along H (sublane axis), zero at image edge
    #   horizontal tap d: shift by d*C lanes inside the flattened W*C axis
    for i in range(k):
        d = i - pad
        if d == 0:
            continue
        wv_i = wv_ref[i, :].reshape(1, WC)
        wh_i = wh_ref[i, :].reshape(1, WC)
        if d > 0:
            tv = jnp.concatenate(
                [x[d:, :], jnp.zeros((d, WC), x.dtype)], axis=0)
            th = jnp.concatenate(
                [x[:, d * C:], jnp.zeros((H, d * C), x.dtype)], axis=1)
        else:
            tv = jnp.concatenate(
                [jnp.zeros((-d, WC), x.dtype), x[:H + d, :]], axis=0)
            th = jnp.concatenate(
                [jnp.zeros((H, -d * C), x.dtype), x[:, :WC + d * C]], axis=1)
        acc = acc + tv.astype(jnp.float32) * wv_i \
                  + th.astype(jnp.float32) * wh_i

    o_ref[0] = jnp.maximum(acc, 0.0).astype(o_ref.dtype)   # ReLU


def fdw_conv_block(x, wv, wh, sv, bv, sh, bh, *, kernel_size, padding,
                   stride=1):
    """x: (B,H,W,C) NHWC. wv/wh: (k,C) depthwise taps. sv/bv/sh/bh: (1,C)
    eval-mode BatchNorm scale/shift for the vertical / horizontal branch."""
    assert stride == 1, "only stride=1 supported"
    assert 2 * padding == kernel_size - 1, "requires 'same' padding config"
    B, H, W, C = x.shape
    k, p = kernel_size, padding
    WC = W * C

    # Fold BN into the taps (wrapper-side, tiny one-off XLA work).
    f32 = jnp.float32
    wv_f = wv.astype(f32) * sv.astype(f32)          # (k, C)
    wh_f = wh.astype(f32) * sh.astype(f32)          # (k, C)
    bias = bv.astype(f32) + bh.astype(f32)          # (1, C)
    # Broadcast per-channel params to the flattened W*C lane axis.
    wv_flat = jnp.tile(wv_f, (1, W))                # (k, W*C)
    wh_flat = jnp.tile(wh_f, (1, W))                # (k, W*C)
    bias_flat = jnp.tile(bias, (1, W))              # (1, W*C)

    # Lane-dense view: trailing dim W*C (free, contiguous reshape).
    x2 = x.reshape(B, H, WC)

    # VMEM budget: whole-image block per grid step (double-buffered in/out).
    itemsize = x.dtype.itemsize
    tile_bytes = H * WC * itemsize
    est_vmem = 4 * tile_bytes + 4 * (2 * k + 1) * WC * 4 + (2 << 20)
    # TODO(synk): add an H-tile grid axis with halo DMA if this assert trips.
    assert est_vmem <= 56 * 2**20, "image too large for whole-image blocking"
    vmem_limit = int(max(32 * 2**20, min(56 * 2**20, est_vmem)))

    kernel = functools.partial(_fdw_kernel, k=k, pad=p, H=H, W=W, C=C)
    out = pl.pallas_call(
        kernel,
        out_shape=jax.ShapeDtypeStruct((B, H, WC), x.dtype),
        grid_spec=pltpu.PrefetchScalarGridSpec(
            num_scalar_prefetch=0,
            grid=(B,),
            in_specs=[
                pl.BlockSpec((1, H, WC), lambda b: (b, 0, 0)),
                pl.BlockSpec((k, WC), lambda b: (0, 0)),
                pl.BlockSpec((k, WC), lambda b: (0, 0)),
                pl.BlockSpec((1, WC), lambda b: (0, 0)),
            ],
            out_specs=pl.BlockSpec((1, H, WC), lambda b: (b, 0, 0)),
        ),
        compiler_params=pltpu.CompilerParams(
            dimension_semantics=("parallel",),
            vmem_limit_bytes=vmem_limit),
    )(x2, wv_flat, wh_flat, bias_flat)
    return out.reshape(B, H, W, C)


def _reference(x, wv, wh, sv, bv, sh, bh, k, p):
    """Pure-JAX reference (module math, unfolded BN, explicit padding)."""
    B, H, W, C = x.shape
    xp = jnp.pad(x, ((0, 0), (p, p), (p, p), (0, 0))).astype(jnp.float32)
    acc_v = sum(xp[:, i:i + H, p:p + W, :] * wv[i] for i in range(k))
    acc_h = sum(xp[:, p:p + H, i:i + W, :] * wh[i] for i in range(k))
    y = acc_v * sv[0] + bv[0] + acc_h * sh[0] + bh[0]
    return jnp.maximum(y, 0.0)


def _fold_bn(gamma, beta, mean, var, eps):
    scale = gamma * jax.lax.rsqrt(var + eps)
    shift = beta - mean * scale
    return scale[None, :], shift[None, :]      # (1, C)


if __name__ == "__main__":
    # Small config consistent with the module: in_channels == out_channels
    # (depthwise), kernel_size=3, stride=1, padding=1.
    B, C, H, W = 2, 4, 16, 16
    k, pad = 3, 1
    bn_eps = 1e-5

    key = jax.random.PRNGKey(0)
    keys = jax.random.split(key, 12)

    # Input (NCHW like PyTorch), converted to NHWC for the kernel.
    x_nchw = jax.random.normal(keys[0], (B, C, H, W), jnp.float32)
    x = jnp.transpose(x_nchw, (0, 2, 3, 1))                 # (B,H,W,C)

    # Depthwise conv weights, PyTorch shapes (C,1,k,1) and (C,1,1,k).
    wv_t = 0.2 * jax.random.normal(keys[1], (C, 1, k, 1), jnp.float32)
    wh_t = 0.2 * jax.random.normal(keys[2], (C, 1, 1, k), jnp.float32)
    wv = jnp.transpose(wv_t[:, 0, :, 0], (1, 0))            # (k, C)
    wh = jnp.transpose(wh_t[:, 0, 0, :], (1, 0))            # (k, C)

    # BatchNorm params (eval mode: running stats folded to scale/shift).
    gamma_v = 1.0 + 0.1 * jax.random.normal(keys[3], (C,), jnp.float32)
    beta_v = 0.1 * jax.random.normal(keys[4], (C,), jnp.float32)
    mean_v = 0.1 * jax.random.normal(keys[5], (C,), jnp.float32)
    var_v = jnp.abs(jax.random.normal(keys[6], (C,), jnp.float32)) + 0.5
    gamma_h = 1.0 + 0.1 * jax.random.normal(keys[7], (C,), jnp.float32)
    beta_h = 0.1 * jax.random.normal(keys[8], (C,), jnp.float32)
    mean_h = 0.1 * jax.random.normal(keys[9], (C,), jnp.float32)
    var_h = jnp.abs(jax.random.normal(keys[10], (C,), jnp.float32)) + 0.5

    sv, bv = _fold_bn(gamma_v, beta_v, mean_v, var_v, bn_eps)
    sh, bh = _fold_bn(gamma_h, beta_h, mean_h, var_h, bn_eps)

    out = fdw_conv_block(x, wv, wh, sv, bv, sh, bh,
                         kernel_size=k, padding=pad, stride=1)
    out = jax.block_until_ready(out)

    ref = _reference(x, wv, wh, sv, bv, sh, bh, k, pad)
    assert out.shape == (B, H, W, C)
    assert jnp.allclose(out, ref, atol=1e-5, rtol=1e-5)

    print("KERNEL_OK")
</pallas_src>

<mosaic_0001>
module attributes {stable_mosaic.version = 11 : i64} {
  func.func @_fdw_kernel(%arg0: i32, %arg1: memref<1x16x64xf32, #tpu.memory_space<vmem>>, %arg2: memref<3x64xf32, #tpu.memory_space<vmem>>, %arg3: memref<3x64xf32, #tpu.memory_space<vmem>>, %arg4: memref<1x64xf32, #tpu.memory_space<vmem>>, %arg5: memref<1x16x64xf32, #tpu.memory_space<vmem>>) attributes {dimension_semantics = [#tpu.dimension_semantics<parallel>], iteration_bounds = array<i64: 2>, scalar_prefetch = 0 : i64, scratch_operands = 0 : i64, tpu.core_type = #tpu.core_type<tc>, window_params = [{transform_indices = @transform_0, window_bounds = array<i64: 1, 16, 64>}, {pipeline_mode = #tpu.pipeline_mode<synchronous>, transform_indices = @transform_1, window_bounds = array<i64: 3, 64>}, {pipeline_mode = #tpu.pipeline_mode<synchronous>, transform_indices = @transform_2, window_bounds = array<i64: 3, 64>}, {pipeline_mode = #tpu.pipeline_mode<synchronous>, transform_indices = @transform_3, window_bounds = array<i64: 1, 64>}, {transform_indices = @transform_4, window_bounds = array<i64: 1, 16, 64>}]} {
    %c0 = arith.constant 0 : index
    %c0_0 = arith.constant 0 : index
    %c0_1 = arith.constant 0 : index
    %0 = vector.load %arg1[%c0, %c0_0, %c0_1] : memref<1x16x64xf32, #tpu.memory_space<vmem>>, vector<1x16x64xf32>
    %1 = vector.shape_cast %0 : vector<1x16x64xf32> to vector<16x64xf32>
    %c1 = arith.constant 1 : index
    %c0_2 = arith.constant 0 : index
    %2 = vector.load %arg2[%c1, %c0_2] : memref<3x64xf32, #tpu.memory_space<vmem>>, vector<1x64xf32>
    %3 = vector.shape_cast %2 : vector<1x64xf32> to vector<64xf32>
    %c1_3 = arith.constant 1 : index
    %c0_4 = arith.constant 0 : index
    %4 = vector.load %arg3[%c1_3, %c0_4] : memref<3x64xf32, #tpu.memory_space<vmem>>, vector<1x64xf32>
    %5 = vector.shape_cast %4 : vector<1x64xf32> to vector<64xf32>
    %6 = arith.addf %3, %5 : vector<64xf32>
    %7 = vector.shape_cast %6 : vector<64xf32> to vector<1x64xf32>
    %8 = vector.broadcast %7 : vector<1x64xf32> to vector<16x64xf32>
    %9 = arith.mulf %1, %8 : vector<16x64xf32>
    %c0_5 = arith.constant 0 : index
    %c0_6 = arith.constant 0 : index
    %10 = vector.load %arg4[%c0_5, %c0_6] : memref<1x64xf32, #tpu.memory_space<vmem>>, vector<1x64xf32>
    %11 = vector.shape_cast %10 : vector<1x64xf32> to vector<64xf32>
    %12 = vector.shape_cast %11 : vector<64xf32> to vector<1x64xf32>
    %13 = vector.broadcast %12 : vector<1x64xf32> to vector<16x64xf32>
    %14 = arith.addf %9, %13 : vector<16x64xf32>
    %c0_7 = arith.constant 0 : index
    %c0_8 = arith.constant 0 : index
    %15 = vector.load %arg2[%c0_7, %c0_8] : memref<3x64xf32, #tpu.memory_space<vmem>>, vector<1x64xf32>
    %16 = vector.shape_cast %15 : vector<1x64xf32> to vector<64xf32>
    %17 = vector.shape_cast %16 : vector<64xf32> to vector<1x64xf32>
    %c0_9 = arith.constant 0 : index
    %c0_10 = arith.constant 0 : index
    %18 = vector.load %arg3[%c0_9, %c0_10] : memref<3x64xf32, #tpu.memory_space<vmem>>, vector<1x64xf32>
    %19 = vector.shape_cast %18 : vector<1x64xf32> to vector<64xf32>
    %20 = vector.shape_cast %19 : vector<64xf32> to vector<1x64xf32>
    %cst = arith.constant 0.000000e+00 : f32
    %21 = vector.broadcast %cst : f32 to vector<1x64xf32>
    %22 = vector.extract_strided_slice %1 {offsets = [0, 0], sizes = [15, 64], strides = [1, 1]} : vector<16x64xf32> to vector<15x64xf32>
    %23 = tpu.concatenate %21, %22 in 0 : vector<1x64xf32>, vector<15x64xf32> -> vector<16x64xf32>
    %cst_11 = arith.constant 0.000000e+00 : f32
    %24 = vector.broadcast %cst_11 : f32 to vector<16x4xf32>
    %25 = vector.extract_strided_slice %1 {offsets = [0, 0], sizes = [16, 60], strides = [1, 1]} : vector<16x64xf32> to vector<16x60xf32>
    %26 = tpu.concatenate %24, %25 in 1 : vector<16x4xf32>, vector<16x60xf32> -> vector<16x64xf32>
    %27 = vector.broadcast %17 : vector<1x64xf32> to vector<16x64xf32>
    %28 = arith.mulf %23, %27 : vector<16x64xf32>
    %29 = arith.addf %14, %28 : vector<16x64xf32>
    %30 = vector.broadcast %20 : vector<1x64xf32> to vector<16x64xf32>
    %31 = arith.mulf %26, %30 : vector<16x64xf32>
    %32 = arith.addf %29, %31 : vector<16x64xf32>
    %c2 = arith.constant 2 : index
    %c0_12 = arith.constant 0 : index
    %33 = vector.load %arg2[%c2, %c0_12] : memref<3x64xf32, #tpu.memory_space<vmem>>, vector<1x64xf32>
    %34 = vector.shape_cast %33 : vector<1x64xf32> to vector<64xf32>
    %35 = vector.shape_cast %34 : vector<64xf32> to vector<1x64xf32>
    %c2_13 = arith.constant 2 : index
    %c0_14 = arith.constant 0 : index
    %36 = vector.load %arg3[%c2_13, %c0_14] : memref<3x64xf32, #tpu.memory_space<vmem>>, vector<1x64xf32>
    %37 = vector.shape_cast %36 : vector<1x64xf32> to vector<64xf32>
    %38 = vector.shape_cast %37 : vector<64xf32> to vector<1x64xf32>
    %39 = vector.extract_strided_slice %1 {offsets = [1, 0], sizes = [15, 64], strides = [1, 1]} : vector<16x64xf32> to vector<15x64xf32>
    %cst_15 = arith.constant 0.000000e+00 : f32
    %40 = vector.broadcast %cst_15 : f32 to vector<1x64xf32>
    %41 = tpu.concatenate %39, %40 in 0 : vector<15x64xf32>, vector<1x64xf32> -> vector<16x64xf32>
    %42 = vector.extract_strided_slice %1 {offsets = [0, 4], sizes = [16, 60], strides = [1, 1]} : vector<16x64xf32> to vector<16x60xf32>
    %cst_16 = arith.constant 0.000000e+00 : f32
    %43 = vector.broadcast %cst_16 : f32 to vector<16x4xf32>
    %44 = tpu.concatenate %42, %43 in 1 : vector<16x60xf32>, vector<16x4xf32> -> vector<16x64xf32>
    %45 = vector.broadcast %35 : vector<1x64xf32> to vector<16x64xf32>
    %46 = arith.mulf %41, %45 : vector<16x64xf32>
    %47 = arith.addf %32, %46 : vector<16x64xf32>
    %48 = vector.broadcast %38 : vector<1x64xf32> to vector<16x64xf32>
    %49 = arith.mulf %44, %48 : vector<16x64xf32>
    %50 = arith.addf %47, %49 : vector<16x64xf32>
    %cst_17 = arith.constant 0.000000e+00 : f32
    %51 = vector.broadcast %cst_17 : f32 to vector<16x64xf32>
    %52 = arith.maximumf %50, %51 : vector<16x64xf32>
    %c0_18 = arith.constant 0 : index
    %c0_19 = arith.constant 0 : index
    %c0_20 = arith.constant 0 : index
    %53 = vector.load %arg5[%c0_18, %c0_19, %c0_20] : memref<1x16x64xf32, #tpu.memory_space<vmem>>, vector<1x16x64xf32>
    %54 = vector.shape_cast %53 : vector<1x16x64xf32> to vector<16x64xf32>
    %55 = vector.shape_cast %52 : vector<16x64xf32> to vector<1x16x64xf32>
    tpu.vector_store %arg5[%c0_18, %c0_19, %c0_20], %55 {strides = array<i32>} : memref<1x16x64xf32, #tpu.memory_space<vmem>>, vector<1x16x64xf32>,
    return
  }
  func.func @transform_0(%arg0: i32) -> (i32, i32, i32) {
    %c0_i32 = arith.constant 0 : i32
    %c0_i32_0 = arith.constant 0 : i32
    %c0_i32_1 = arith.constant 0 : i32
    return %arg0, %c0_i32, %c0_i32_0 : i32, i32, i32
  }
  func.func @transform_1(%arg0: i32) -> (i32, i32) {
    %c0_i32 = arith.constant 0 : i32
    %c0_i32_0 = arith.constant 0 : i32
    %c0_i32_1 = arith.constant 0 : i32
    return %c0_i32, %c0_i32_0 : i32, i32
  }
  func.func @transform_2(%arg0: i32) -> (i32, i32) {
    %c0_i32 = arith.constant 0 : i32
    %c0_i32_0 = arith.constant 0 : i32
    %c0_i32_1 = arith.constant 0 : i32
    return %c0_i32, %c0_i32_0 : i32, i32
  }
  func.func @transform_3(%arg0: i32) -> (i32, i32) {
    %c0_i32 = arith.constant 0 : i32
    %c0_i32_0 = arith.constant 0 : i32
    %c0_i32_1 = arith.constant 0 : i32
    return %c0_i32, %c0_i32_0 : i32, i32
  }
  func.func @transform_4(%arg0: i32) -> (i32, i32, i32) {
    %c0_i32 = arith.constant 0 : i32
    %c0_i32_0 = arith.constant 0 : i32
    %c0_i32_1 = arith.constant 0 : i32
    return %arg0, %c0_i32, %c0_i32_0 : i32, i32, i32
  }
}

</mosaic_0001>

<bundles_post_ra>
// kernel: tpu_custom_call.1
= control target key start
LH: loop header
LB: loop body
LE: loop exit
PB: predicated region body
PF: predicated region fallthrough
CT: control target
= control target key end

     0   :  { %9 = vsyncpa [#allocation3], 0  ;;  %s891_s0 = inlined_call_operand.hbm [shape: f32[2,16,64], index: 0, kind: input, shape index: {}]   ;;  %s892_s1 = inlined_call_operand.hbm [shape: f32[3,64], index: 1, kind: input, shape index: {}]   ;;  %s893_s2 = inlined_call_operand.vmem [shape: f32[3,64], index: 2, kind: input, shape index: {}]   ;;  %s894_s3 = inlined_call_operand.vmem [shape: f32[1,64], index: 3, kind: input, shape index: {}]   ;;  %s895_s4 = inlined_call_operand.hbm [shape: f32[2,16,64], index: 4, kind: output, shape index: {}]  }
   0x1   :  { %11 = vsyncpa [#allocation3 + $0x1], 0 }
   0x2   :  { %12 = vsyncpa [#allocation6], 0 }
   0x3   :  { %13 = vsyncpa [#allocation4], 0 }
   0x4   :  { %15 = vsyncpa [#allocation4 + $0x1], 0  ;;  %s671_s15 = smov 0   ;;  %s673_s16 = smov 0  }
   0x5   :  { %s675_s17 = smov 0   ;;  %s677_s18 = smov 0  }
   0x6 LB: > { %s692_s19 = sadd.s32 4294967295, %s635_s18   ;;  %s421_s20 = sadd.s32 4294967294, %s635_s18   ;;  %s635_s18 = sphi %s677_s18, %s920_s18   ;;  %s631_s17 = sphi %s675_s17, %s919_s17   ;;  %s627_s16 = sphi %s673_s16, %s918_s16   ;;  %s623_s15 = sphi %s671_s15, %s917_s15  }
   0x7   : > { %s696_s21 = sadd.s32 1, %s635_s18   ;;  %s28_s22 = sadd.s32 1, %s631_s17 }
   0x8   : > { %s25_s23 = ssub.s32 %s635_s18, %s696_s21  ;;  %p35_p0 = scmp.ne.s32.totalorder %s631_s17, %s627_s16 }
   0x9   : > { %p26_p1 = scmp.eq.s32.totalorder %s25_s23, 0  ;;  %p36_p2 = scmp.eq.s32.totalorder %s635_s18, 0 }
   0xa   : > { %p41_p3 = scmp.ne.s32.totalorder %s627_s16, %s623_s15  ;;  %p896_p4 = scmp.eq.s32.totalorder %s692_s19, 0 }
   0xb   : > { %s708_s24 = scalar_select %p26_p1, %s631_s17, %s28_s22  }
   0xc   : > { %p710_p5 = por %p36_p2, %p35_p0  ;;  %p716_p6 = por %p896_p4, %p41_p3 }
   0xd   : > { %p128_p7 = scmp.eq.s32.totalorder %s692_s19, 1  ;;  %p134_p8 = scmp.eq.s32.totalorder %s421_s20, 1 }
   0xe   : > { %s902_s26 = scalar_select %p716_p6, 1, 0 }
   0xf   : > { %p422_p9 = scmp.ge.s32.totalorder %s635_s18, 1  ;;  %p141_p10 = scmp.lt.s32.totalorder %s635_s18, 3 }
  0x10   : > { %p723_p11 = por %p128_p7, %p35_p0  ;;  %p727_p12 = por %p134_p8, %p41_p3 }
  0x11   : > { %p731_p13 = pnand %p422_p9, %p141_p10  ;;  %s637_s30 = smov [#allocation5]  }
  0x12   : > { %s903_s27 = scalar_select %p723_p11, 1, 0 }
  0x13   : > { %s904_s28 = scalar_select %p727_p12, 1, 0 }
  0x14   : > { %s905_s29 = scalar_select %p731_p13, 1, 0 }
  0x15   : > { %p452_p2 = pneg %p731_p13  ;;  %s154_s5 = sshll.u32 %s637_s30, 4  ;;  %s155_s5 = int_to_ptr.vmem [resolvable:$true] %s154_s5 }
  0x16   : > { %p465_p4 = scmp.lt.s32.totalorder %s635_s18, 2  ;;  %p906_p0 = scmp.eq.s32.totalorder %s692_s19, 0 }
  0x17   : > { %s171_s7 = sand.u32 1, %s631_s17   ;;  %s507_s12 = scalar_lea.hbm %s892_s1, 64 }
  0x18   : > { %p741_p7 = pnand %p452_p2, %p906_p0  ;;  %p748_p3 = pnand %p465_p4, %p710_p5 }
  0x19   : > { %s425_s9 = sshll.u32 %s171_s7, 4  ;;  %p508_p8 = scmp.ne.s32.totalorder %s892_s1, %s507_s12 }
  0x1a   : > { %s908_s8 = scalar_select %p748_p3, 1, 0 }
  0x1b   : > { %p509_p9 = pneg %p741_p7  ;;  %p514_p4 = scmp.lt.u32.totalorder %s507_s12, %s892_s1 }
  0x1d   : > { %p510_p10 = pnand %p509_p9, %p508_p8 }
  0x1f   : > { %p511_p2 = pneg %p510_p10 }
  0x21   : > { %p516_p5 = pnand %p514_p4, %p511_p2 }
  0x23   : > { %519 = shalt.err (!%p516_p5)
}
  0x24   : > { %s520_s23 = scalar_lea.vmem %s155_s5, 64  ;;  %p528_p11 = scmp.lt.s32.totalorder %s155_s5, %s155_s5 }
  0x25   : > { %p521_p0 = scmp.ne.s32.totalorder %s155_s5, %s520_s23  ;;  %p529_p6 = scmp.lt.s32.totalorder %s520_s23, %s520_s23 }
  0x27   : > { %p523_p1 = pnand %p521_p0, %p509_p9  ;;  %p530_p13 = por %p529_p6, %p528_p11 }
  0x29   : > { %p524_p12 = pneg %p523_p1 }
  0x2b   : > { %p531_p3 = pnand %p530_p13, %p524_p12 }
  0x2d   : > { %534 = shalt.err (!%p531_p3)
}
  0x2e   : > { %455 = dma.hbm_to_vmem [thread:$0]  (!%p741_p7), %s892_s1, 64, %s155_s5, [#allocation6]  }
  0x2f   : > { %s442_s10 = sshll.u32 %s635_s18, 8  ;;  %s175_s11 = scalar_lea.vmem [#allocation2], %s425_s9 }
  0x30   : > { %s182_s12 = sshll.u32 %s175_s11, 4  ;;  %s772_s20 = scalar_lea.hbm %s891_s0, %s442_s10  ;;  %s774_s12 = int_to_ptr.vmem [resolvable:$true] %s182_s12 }
  0x31   : > { %s776_s6 = scalar_lea.sflag [#allocation3], %s171_s7  ;;  %s535_s22 = scalar_lea.hbm %s772_s20, 256 }
  0x32   : > { %p536_p6 = scmp.ne.s32.totalorder %s772_s20, %s535_s22  ;;  %p909_p11 = scmp.ne.s32.totalorder %s908_s8, 0 }
  0x33   : > { %s540_s23 = scalar_lea.hbm %s891_s0, 512  ;;  %p541_p7 = scmp.lt.u32.totalorder %s772_s20, %s891_s0 }
  0x34   : > { %p537_p12 = pneg %p909_p11  ;;  %p542_p3 = scmp.lt.u32.totalorder %s540_s23, %s535_s22 }
  0x35   : > { %p544_p9 = scmp.lt.u32.totalorder %s535_s22, %s772_s20 }
  0x36   : > { %p538_p13 = pnand %p537_p12, %p536_p6  ;;  %p543_p8 = por %p542_p3, %p541_p7 }
  0x38   : > { %p539_p1 = pneg %p538_p13  ;;  %p545_p10 = por %p544_p9, %p543_p8 }
  0x3a   : > { %p546_p2 = pnand %p545_p10, %p539_p1 }
  0x3c   : > { %549 = shalt.err (!%p546_p2)
}
  0x3d   : > { %s550_s7 = scalar_lea.vmem %s774_s12, 256  ;;  %s638_s10 = smov [#allocation2]  }
  0x3e   : > { %p551_p4 = scmp.ne.s32.totalorder %s774_s12, %s550_s7  ;;  %s555_s11 = sshll.u32 %s638_s10, 4  ;;  %s556_s11 = int_to_ptr.vmem [resolvable:$false] %s555_s11 }
  0x3f   : > { %s557_s13 = scalar_lea.vmem %s556_s11, 512  ;;  %p558_p6 = scmp.lt.s32.totalorder %s774_s12, %s556_s11 }
  0x40   : > { %p553_p5 = pnand %p551_p4, %p537_p12  ;;  %p559_p13 = scmp.lt.s32.totalorder %s557_s13, %s550_s7 }
  0x42   : > { %p554_p0 = pneg %p553_p5  ;;  %p560_p7 = por %p559_p13, %p558_p6 }
  0x44   : > { %p561_p3 = pnand %p560_p7, %p554_p0 }
  0x46   : > { %564 = shalt.err (!%p561_p3)
}
  0x47   : > { %s639_s14 = smov 128   ;;  %s640_s22 = smov 8  }
  0x48   : > { %459 = dma.hbm_to_vmem [thread:$0]  (!%p909_p11), %s772_s20, 256, %s774_s12, %s776_s6, %s639_s14, %s639_s14, %s640_s22  }
  0x49   : > { %p910_p12 = scmp.ne.s32.totalorder %s905_s29, 0 }
  0x4a   : > { %s807_s5 = sand.u32 (!%p910_p12), 1, %s627_s16   ;;  %p911_p1 = scmp.ne.s32.totalorder (!%p910_p12), %s902_s26, 0 }
  0x4b   : > { %194 = sbr.rel (%p910_p12) target bundleno = 232 (0xe8), region = 36  ;;  %s429_s9 = sshll.u32 (!%p910_p12), %s807_s5, 4 }
  0x4c   : > { %s197_s23 = scalar_lea.sflag (!%p910_p12), [#allocation3], %s807_s5  ;;  %s200_s25 = scalar_lea.vmem (!%p910_p12), [#allocation2], %s429_s9 }
  0x52   : > { %610 = dma.done.wait (%p911_p1), %s197_s23, 256  }
  0x53   : > { %612 = vsyncadd (%p911_p1), %s197_s23, 4294967040  ;;  %p912_p11 = scmp.eq.s32.totalorder %s692_s19, 0 }
  0x55   : > { %614 = dma.done.wait (%p912_p11), [#allocation6], 64   ;;  %p913_p8 = pmov %p912_p11 }
  0x56   : > { %v234_v0 = vlaneseq  ;;  %v229_v2 = vld [vmem:[%s200_s25] sm:$0xff]  ;;  %v230_v3 = vld [vmem:[%s200_s25 + $0x8] sm:$0xff]  ;;  %vm287_vm0 = vcmask 1046528   ;;  %s641_s29 = smov 4   ;;  %s642_s8 = smov 124   ;;  %vm253_vm1 = vcmask 1040384  }
  0x57   : > { %616 = vsyncadd (%p913_p8), [#allocation6], 4294967232  ;;  %v231_v4 = vld [vmem:[#allocation5 + $0x1] sm:$0x1]  ;;  %260 = vrot.lane.b32.xlu0 %v229_v2, %s641_s29  ;;  %v288_v6 = vrot.slane %v229_v2, 1  ;;  %294 = vrot.lane.b32.xlu1 %v229_v2, %s642_s8  ;;  %v255_v7 = vrot.slane %v230_v3, 7 }
  0x58   : > { %v235_v1 = vshrl.u32 %v234_v0, 7  ;;  %v289_v8 = vrot.slane %v230_v3, 1  ;;  %v232_v9 = vld [vmem:[%s893_s2 + $0x1] sm:$0x1]  ;;  %v254_v10 = vrot.slane %v229_v2, 7  ;;  %vm266_vm2 = vcmask 31744  }
  0x59   : > { %v233_v11 = vadd.f32 %v232_v9, %v231_v4  ;;  %v433_v15 = vld [vmem:[#allocation5] ss:$0 sm:$0xff]  ;;  %vm300_vm3 = vcmask 490496   ;;  %v435_v26 = vld [vmem:[#allocation5 + $0x2] ss:$0 sm:$0xff]  ;;  %vm321_vm4 = vcmask 523264  }
  0x5a   : > { %v236_v5 = vsub.s32 0, %v235_v1  ;;  %v290_v12 = vsel %vm287_vm0, %v288_v6, %v289_v8  ;;  %v256_v13 = vsel %vm253_vm1, %v254_v10, %v255_v7  ;;  %v432_v18 = vld [vmem:[%s894_s3] ss:$0 sm:$0xff]  ;;  %v259_v22 = vsel %vm253_vm1, 0.0, %v254_v10  ;;  %v436_v31 = vld [vmem:[%s893_s2 + $0x2] ss:$0 sm:$0xff] }
  0x5b   : > { %262 = vrot.lane.b32.xlu0 %v230_v3, %s641_s29  ;;  %296 = vrot.lane.b32.xlu1 %v230_v3, %s642_s8  ;;  %v274_v17 = vmul.f32 %v433_v15, %v256_v13  ;;  %v273_v24 = vmul.f32 %v433_v15, %v259_v22  ;;  %v434_v25 = vld [vmem:[%s893_s2] ss:$0 sm:$0xff]  ;;  %v307_v34 = vmul.f32 %v435_v26, %v290_v12  ;;  %v293_v35 = vsel %vm287_vm0, %v289_v8, 0.0  ;;  %s443_s13 = sshll.u32 %s692_s19, 8  ;;  %s228_s14 = scalar_lea.vmem [#allocation7], %s429_s9 }
  0x5c   : > { %v237_v14 = vrot.slane %v233_v11, %v236_v5  ;;  %v308_v44 = vmul.f32 %v435_v26, %v293_v35  ;;  %s338_s22 = sshll.u32 %s228_s14, 4  ;;  %s845_s29 = scalar_lea.hbm %s895_s4, %s443_s13  ;;  %s847_s22 = int_to_ptr.vmem [resolvable:$true] %s338_s22 }
  0x5d   : > { %s325_s8 = scalar_lea.sflag [#allocation4], %s807_s5  ;;  %s565_s26 = scalar_lea.vmem %s847_s22, 256 }
  0x5e   : > { %v239_v16 = vmul.f32 %v237_v14, %v230_v3  ;;  %v238_v21 = vmul.f32 %v237_v14, %v229_v2  ;;  %p566_p9 = scmp.ne.s32.totalorder %s847_s22, %s565_s26  ;;  %p914_p10 = scmp.ne.s32.totalorder %s903_s27, 0 }
  0x5f   : > { %s643_s19 = smov [#allocation7]  }
  0x60   : > { %v248_v19 = vadd.f32 %v432_v18, %v239_v16  ;;  %v247_v23 = vadd.f32 %v432_v18, %v238_v21  ;;  %p567_p2 = pnand %p566_p9, %p914_p10  ;;  %s569_s9 = sshll.u32 %s643_s19, 4  ;;  %s570_s9 = int_to_ptr.vmem [resolvable:$false] %s569_s9 }
  0x61   : > { %s571_s12 = scalar_lea.vmem %s570_s9, 512  ;;  %p572_p5 = scmp.lt.s32.totalorder %s847_s22, %s570_s9 }
  0x62   : > { %v276_v20 = vadd.f32 %v274_v17, %v248_v19  ;;  %v275_v28 = vadd.f32 %v273_v24, %v247_v23  ;;  %p568_p4 = pneg %p567_p2  ;;  %p573_p0 = scmp.lt.s32.totalorder %s571_s12, %s565_s26 }
  0x64   : > { %p574_p6 = por %p573_p0, %p572_p5 }
  0x66   : > { %p575_p13 = pnand %p574_p6, %p568_p4 }
  0xc9   : > { %v261_v27 = vpop.permute.xlu0 %260  ;;  %v295_v29 = vpop.permute.xlu1 %294 }
  0xca   : > { %v267_v30 = vsel %vm266_vm2, 0.0, %v261_v27  ;;  %v301_v32 = vsel %vm300_vm3, %v295_v29, 0.0 }
  0xcb   : > { %v281_v33 = vmul.f32 %v434_v25, %v267_v30  ;;  %v315_v37 = vmul.f32 %v436_v31, %v301_v32 }
  0xcd   : > { %v283_v36 = vadd.f32 %v281_v33, %v275_v28  ;;  %v263_v38 = vpop.permute.xlu0 %262  ;;  %v297_v39 = vpop.permute.xlu1 %296 }
  0xce   : > { %v268_v40 = vsel %vm266_vm2, 0.0, %v263_v38  ;;  %v302_v41 = vsel %vm300_vm3, %v297_v39, 0.0 }
  0xcf   : > { %v309_v42 = vadd.f32 %v307_v34, %v283_v36  ;;  %v282_v43 = vmul.f32 %v434_v25, %v268_v40  ;;  %v316_v47 = vmul.f32 %v436_v31, %v302_v41 }
  0xd1   : > { %v317_v45 = vadd.f32 %v315_v37, %v309_v42  ;;  %v284_v46 = vadd.f32 %v282_v43, %v276_v20 }
  0xd3   : > { %v319_v48 = vmax.f32 %v317_v45, 0.0  ;;  %v310_v49 = vadd.f32 %v308_v44, %v284_v46 }
  0xd5   : > { %322 = vst.msk [vmem:[%s228_s14] sm:$0xff] %vm321_vm4, %v319_v48  ;;  %v318_v50 = vadd.f32 %v316_v47, %v310_v49 }
  0xd7   : > { %v320_v51 = vmax.f32 %v318_v50, 0.0 }
  0xd9   : > { %323 = vst.msk [vmem:[%s228_s14 + $0x8] sm:$0xff] %vm321_vm4, %v320_v51 }
  0xda   : > { %578 = shalt.err (!%p575_p13)
}
  0xdb   : > { %s579_s20 = scalar_lea.hbm %s845_s29, 256  ;;  %s583_s7 = scalar_lea.hbm %s895_s4, 512 }
  0xdc   : > { %p580_p7 = scmp.ne.s32.totalorder %s845_s29, %s579_s20  ;;  %p584_p1 = scmp.lt.u32.totalorder %s845_s29, %s895_s4 }
  0xdd   : > { %p585_p11 = scmp.lt.u32.totalorder %s583_s7, %s579_s20  ;;  %p587_p9 = scmp.lt.u32.totalorder %s579_s20, %s845_s29 }
  0xde   : > { %p581_p3 = pnand %p580_p7, %p914_p10 }
  0xdf   : > { %p586_p8 = por %p585_p11, %p584_p1 }
  0xe0   : > { %p582_p12 = pneg %p581_p3 }
  0xe1   : > { %p588_p2 = por %p587_p9, %p586_p8 }
  0xe3   : > { %p589_p4 = pnand %p588_p2, %p582_p12 }
  0xe5   : > { %592 = shalt.err (!%p589_p4)
}
  0xe6   : > { %s644_s13 = smov 128   ;;  %s645_s14 = smov 8  }
  0xe7   : > { %450 = dma.vmem_to_hbm [thread:$0]  (%p914_p10), %s847_s22, 256, %s845_s29, %s325_s8, %s644_s13, %s644_s13, %s645_s14  }
  0xe8 PF: > { %s353_s23 = sand.u32 1, %s623_s15   ;;  %p915_p5 = scmp.ne.s32.totalorder %s904_s28, 0 }
  0xe9   : > { %p916_p0 = scmp.ge.s32.totalorder %s635_s18, 2  ;;  %s354_s25 = scalar_lea.sflag [#allocation4], %s353_s23 }
  0xeb   : > { %p461_p6 = pnand %p916_p0, %p915_p5 }
  0xed   : > { %618 = dma.done.wait (!%p461_p6), %s354_s25, 256  }
  0xee   : > { %620 = vsyncadd (!%p461_p6), %s354_s25, 4294967040  ;;  %p18_p13 = scmp.ge.s32.totalorder %s696_s21, 4   ;;  %s917_s15 = smov %s627_s16 }
  0xef   : > { %s918_s16 = smov %s631_s17  ;;  %s919_s17 = smov %s708_s24 }
  0xf0   : > { %s920_s18 = smov %s696_s21  ;;  %20 = sbr.rel (!%p18_p13) target bundleno = 6 (0x6), region = 85 }
  0xf7   :  { %359 = vsyncpa [#allocation3], 1 }
  0xf8   :  { %361 = vsyncpa [#allocation3 + $0x1], 1 }
  0xf9   :  { %362 = vsyncpa [#allocation6], 1 }
  0xfa   :  { %363 = vsyncpa [#allocation4], 1 }
  0xfb   :  { %365 = vsyncpa [#allocation4 + $0x1], 1 }

</bundles_post_ra>
